<compile_context>
chip_gen: v7x
topology: tpu7x:2x2x1
jax: 0.10.0
libtpu: 0.0.40
codegen_flags: <defaults>
</compile_context>

<pallas_src>
import jax
import jax.numpy as jnp
from jax.experimental import pallas as pl
from jax.experimental.pallas import tpu as pltpu

_LANE = 128
_WIDTH_CANDIDATES = (8192, 4096, 2048, 1024, 512, 256, 128)
_TARGET_BLOCK_BYTES = 4 * 1024 * 1024   # ~4 MiB per block
_VMEM_LIMIT_BYTES = 32 * 1024 * 1024    # 2x(in) + 2x(out) 4 MiB buffers + headroom
_XLA_BYPASS_BYTES = 256 * 1024          # tiny tensors: let XLA fuse it
_SPLIT_BYTES = 256 * 1024               # mid-size: split so v7x's 2 TCs both stream


def _normalize_kernel(x_ref, o_ref):
    # (x - 0.5) / 0.5 == 2*x - 1 : one VPU mul + add, no divide/reciprocal.
    o_ref[...] = x_ref[...] * 2.0 - 1.0


def _choose_width(total: int):
    """Largest lane-dense width (multiple of 128, capped at 8192) dividing total."""
    for w in _WIDTH_CANDIDATES:
        if total % w == 0:
            return w
    return None


def _sublane_align(dtype) -> int:
    # f32 -> 8, bf16/f16 -> 16, int8/fp8 -> 32 (sub-32-bit packs along sublanes).
    itemsize = jnp.dtype(dtype).itemsize
    return max(8, 32 // max(1, itemsize))


def _choose_block_rows(rows: int, width: int, dtype) -> int:
    """Rows per block: ~4 MiB, sublane-aligned, grid length biased to be even."""
    itemsize = jnp.dtype(dtype).itemsize
    align = _sublane_align(dtype)
    bytes_per_row = width * itemsize
    max_rows = max(align, (_TARGET_BLOCK_BYTES // bytes_per_row) // align * align)
    total_bytes = rows * bytes_per_row

    if rows <= max_rows:
        # Whole tensor fits in one block.  For mid-size tensors split into two
        # aligned blocks so both v7x TensorCores drive HBM; the (possibly
        # ragged) second block is masked and costs nothing extra.
        if total_bytes >= _SPLIT_BYTES and rows >= 2 * align:
            half = (pl.cdiv(rows, 2) + align - 1) // align * align
            return min(half, rows)
        return rows  # single block == full rows extent (always a legal shape)

    # Many blocks: keep ~max_rows-sized blocks.  Never shrink below max_rows//2
    # (stay on the roofline plateau); only nudge the size to make the grid
    # length even for v7x's two cores.  Ragged final block is masked -> free.
    floor = max(align, (max_rows // 2) // align * align)
    cand = max_rows
    while cand >= floor:
        if pl.cdiv(rows, cand) % 2 == 0:
            return cand
        cand -= align
    return max_rows


def _normalize_2d(x2d: jax.Array, *, alias_input: bool = False) -> jax.Array:
    rows, width = x2d.shape
    itemsize = jnp.dtype(x2d.dtype).itemsize
    block_rows = _choose_block_rows(rows, width, x2d.dtype)
    grid = (pl.cdiv(rows, block_rows),)
    total = rows * width

    # NOTE: pipeline_mode=pl.Buffered(3) is a possible few-percent win on very
    # large tensors; left at the default 2-deep buffering (keep only if measured).
    return pl.pallas_call(
        _normalize_kernel,
        out_shape=jax.ShapeDtypeStruct((rows, width), x2d.dtype),
        grid_spec=pltpu.PrefetchScalarGridSpec(
            num_scalar_prefetch=0,
            grid=grid,
            in_specs=[pl.BlockSpec((block_rows, width), lambda i: (i, 0))],
            out_specs=pl.BlockSpec((block_rows, width), lambda i: (i, 0)),
        ),
        compiler_params=pltpu.CompilerParams(
            dimension_semantics=("parallel",),
            vmem_limit_bytes=_VMEM_LIMIT_BYTES,
        ),
        cost_estimate=pl.CostEstimate(
            flops=2 * total,
            transcendentals=0,
            bytes_accessed=2 * total * itemsize,
        ),
        # Only pays off when the caller donates the input buffer under jit
        # (e.g. jax.jit(..., donate_argnums=0)); without donation XLA inserts
        # a defensive copy and the alias is a no-op.
        input_output_aliases=({0: 0} if alias_input else {}),
    )(x2d)


def normalize_layer(x: jax.Array, *, alias_input: bool = False,
                    force_pallas: bool = False) -> jax.Array:
    """(x - 0.5) / 0.5 elementwise, Pallas TPU kernel for large float tensors.

    Small tensors (< 256 KiB) and ragged flat sizes (not a multiple of 128)
    are handled by a single fused XLA `x*2 - 1` pass, which is strictly
    faster for those cases (no launch overhead, no pad/strip HBM round-trips,
    and fusable with neighbouring ops).  force_pallas=True routes through the
    kernel regardless.  alias_input=True only helps under a donated jit.
    """
    orig_shape = x.shape
    total = x.size
    itemsize = jnp.dtype(x.dtype).itemsize

    if total == 0:
        return x * 2.0 - 1.0

    width = _choose_width(total)
    small = total * itemsize < _XLA_BYPASS_BYTES
    if width is None or (small and not force_pallas):
        # Ragged or tiny: one fused XLA elementwise pass.
        return x * 2.0 - 1.0

    rows = total // width
    x2d = x.reshape(rows, width)  # layout no-op on a contiguous array
    out2d = _normalize_2d(x2d, alias_input=alias_input)
    return out2d.reshape(orig_shape)


if __name__ == "__main__":
    key = jax.random.PRNGKey(0)
    k1, k2, k3 = jax.random.split(key, 3)

    # 1) Small NCHW input (the module's typical use).  Forced through the
    #    Pallas path so the kernel itself is exercised at the demo shape.
    x = jax.random.uniform(k1, (2, 4, 16, 16), dtype=jnp.float32)
    ref = (x - 0.5) / 0.5
    out = jax.block_until_ready(normalize_layer(x, force_pallas=True))
    assert out.shape == x.shape and out.dtype == x.dtype
    assert jnp.allclose(out, ref, atol=1e-6), "mismatch vs reference (pallas)"

    # 2) Mid-size tensor: takes the kernel path naturally and exercises the
    #    multi-block, even-length parallel grid (2 blocks of 8x8192).
    y = jax.random.uniform(k2, (8, 4, 64, 64), dtype=jnp.float32)
    out_y = jax.block_until_ready(normalize_layer(y))
    assert jnp.allclose(out_y, (y - 0.5) / 0.5, atol=1e-6), "mismatch (mid-size)"

    # 3) Ragged flat size: fused XLA fallback (no pad/strip HBM passes).
    z = jax.random.uniform(k3, (2, 3, 7, 5), dtype=jnp.float32)
    out_z = jax.block_until_ready(normalize_layer(z))
    assert out_z.shape == z.shape
    assert jnp.allclose(out_z, (z - 0.5) / 0.5, atol=1e-6), "mismatch (ragged)"

    print("KERNEL_OK")
</pallas_src>

<mosaic_0001>
module attributes {stable_mosaic.version = 11 : i64} {
  func.func @_normalize_kernel(%arg0: i32, %arg1: memref<1x2048xf32, #tpu.memory_space<vmem>>, %arg2: memref<1x2048xf32, #tpu.memory_space<vmem>>) attributes {dimension_semantics = [#tpu.dimension_semantics<parallel>], iteration_bounds = array<i64: 1>, scalar_prefetch = 0 : i64, scratch_operands = 0 : i64, tpu.core_type = #tpu.core_type<tc>, window_params = [{transform_indices = @transform_0, window_bounds = array<i64: 1, 2048>}, {transform_indices = @transform_1, window_bounds = array<i64: 1, 2048>}]} {
    %c0 = arith.constant 0 : index
    %c0_0 = arith.constant 0 : index
    %0 = vector.load %arg1[%c0, %c0_0] : memref<1x2048xf32, #tpu.memory_space<vmem>>, vector<1x2048xf32>
    %cst = arith.constant 2.000000e+00 : f32
    %1 = vector.broadcast %cst : f32 to vector<1x2048xf32>
    %2 = arith.mulf %0, %1 : vector<1x2048xf32>
    %cst_1 = arith.constant 1.000000e+00 : f32
    %3 = vector.broadcast %cst_1 : f32 to vector<1x2048xf32>
    %4 = arith.subf %2, %3 : vector<1x2048xf32>
    %c0_2 = arith.constant 0 : index
    %c0_3 = arith.constant 0 : index
    %5 = vector.load %arg2[%c0_2, %c0_3] : memref<1x2048xf32, #tpu.memory_space<vmem>>, vector<1x2048xf32>
    tpu.vector_store %arg2[%c0_2, %c0_3], %4 {strides = array<i32>} : memref<1x2048xf32, #tpu.memory_space<vmem>>, vector<1x2048xf32>,
    return
  }
  func.func @transform_0(%arg0: i32) -> (i32, i32) {
    %c0_i32 = arith.constant 0 : i32
    %c0_i32_0 = arith.constant 0 : i32
    return %arg0, %c0_i32 : i32, i32
  }
  func.func @transform_1(%arg0: i32) -> (i32, i32) {
    %c0_i32 = arith.constant 0 : i32
    %c0_i32_0 = arith.constant 0 : i32
    return %arg0, %c0_i32 : i32, i32
  }
}

</mosaic_0001>

<bundles_post_ra>
// kernel: tpu_custom_call.1
= control target key start
LH: loop header
LB: loop body
LE: loop exit
PB: predicated region body
PF: predicated region fallthrough
CT: control target
= control target key end

     0   :  { %6 = vsyncpa [#allocation3], 0  ;;  %s132_s0 = inlined_call_operand.hbm [shape: f32[1,2048], index: 0, kind: input, shape index: {}]   ;;  %s133_s1 = inlined_call_operand.hbm [shape: f32[1,2048], index: 1, kind: output, shape index: {}]  }
   0x1   :  { %7 = vsyncpa [#allocation4], 0  ;;  %s96_s6 = smov [#allocation2]   ;;  %s48_s10 = scalar_lea.hbm %s132_s0, 256 }
   0x2   :  { %s14_s7 = sshll.u32 %s96_s6, 4  ;;  %p49_p0 = scmp.ne.s32.totalorder %s132_s0, %s48_s10  ;;  %s15_s7 = int_to_ptr.vmem [resolvable:$true] %s14_s7 }
   0x3   :  { %p52_p1 = scmp.lt.u32.totalorder %s48_s10, %s132_s0 }
   0x5   :  { %p54_p2 = pnand %p52_p1, %p49_p0 }
   0x7   :  { %57 = shalt.err (!%p54_p2)
}
   0x8   :  { %s58_s15 = scalar_lea.vmem %s15_s7, 256  ;;  %p63_p4 = scmp.lt.s32.totalorder %s15_s7, %s15_s7 }
   0x9   :  { %p59_p3 = scmp.ne.s32.totalorder %s15_s7, %s58_s15  ;;  %p64_p5 = scmp.lt.s32.totalorder %s58_s15, %s58_s15 }
   0xb   :  { %p65_p6 = por %p64_p5, %p63_p4 }
   0xd   :  { %p66_p7 = pnand %p65_p6, %p59_p3 }
   0xf   :  { %69 = shalt.err (!%p66_p7)
}
  0x10   :  { %17 = dma.hbm_to_vmem [thread:$0]  %s132_s0, 256, %s15_s7, [#allocation3]  }
  0x11   :  { %92 = dma.done.wait [#allocation3], 256  }
  0x12   :  { %93 = vsyncadd [#allocation3], 4294967040  ;;  %v21_v0 = vld [vmem:[#allocation2] sm:$0xff]  ;;  %v22_v1 = vld [vmem:[#allocation2 + $0x8] sm:$0xff]  ;;  %s97_s18 = smov [#allocation5]  }
  0x13   :  { %s35_s19 = sshll.u32 %s97_s18, 4  ;;  %v23_v2 = vmul.f32 2.0, %v21_v0  ;;  %v24_v3 = vmul.f32 2.0, %v22_v1  ;;  %s36_s19 = int_to_ptr.vmem [resolvable:$true] %s35_s19 }
  0x14   :  { %s70_s20 = scalar_lea.vmem %s36_s19, 256  ;;  %p75_p9 = scmp.lt.s32.totalorder %s36_s19, %s36_s19 }
  0x15   :  { %v44_v4 = vadd.f32 -1.0, %v23_v2  ;;  %v45_v5 = vadd.f32 -1.0, %v24_v3  ;;  %p71_p8 = scmp.ne.s32.totalorder %s36_s19, %s70_s20  ;;  %p76_p10 = scmp.lt.s32.totalorder %s70_s20, %s70_s20 }
  0x17   :  { %27 = vst [vmem:[#allocation5] sm:$0xff] %v44_v4  ;;  %28 = vst [vmem:[#allocation5 + $0x8] sm:$0xff] %v45_v5  ;;  %p77_p11 = por %p76_p10, %p75_p9 }
  0x19   :  { %p78_p12 = pnand %p77_p11, %p71_p8 }
  0x1b   :  { %81 = shalt.err (!%p78_p12)
}
  0x1c   :  { %s82_s22 = scalar_lea.hbm %s133_s1, 256 }
  0x1d   :  { %p83_p13 = scmp.ne.s32.totalorder %s133_s1, %s82_s22  ;;  %p86_p0 = scmp.lt.u32.totalorder %s82_s22, %s133_s1 }
  0x1f   :  { %p88_p1 = pnand %p86_p0, %p83_p13 }
  0x21   :  { %91 = shalt.err (!%p88_p1)
}
  0x22   :  { %38 = dma.vmem_to_hbm [thread:$0]  %s36_s19, 256, %s133_s1, [#allocation4]  }
  0x23   :  { %94 = dma.done.wait [#allocation4], 256  }
  0x24   :  { %95 = vsyncadd [#allocation4], 4294967040 }
  0x25   :  { %42 = vsyncpa [#allocation3], 1 }
  0x26   :  { %43 = vsyncpa [#allocation4], 1 }

</bundles_post_ra>
